<compile_context>
chip_gen: v5e
topology: v5e:2x2
jax: 0.10.0
libtpu: 0.0.40
codegen_flags: <defaults>
</compile_context>

<pallas_src>
import functools

import jax
import jax.numpy as jnp
from jax.experimental import pallas as pl
from jax.experimental.pallas import tpu as pltpu


def _moe_kernel(idx_ref, g_ref, x_ref, w1_ref, w2_ref, o_ref, xin_ref, acc_ref):
    """One grid step = (one expert e, one f-tile fi).

    Blocks seen by the kernel:
      idx_ref : [1, 1, nk]   flat token indices (b*t + tok) selected by expert e
      g_ref   : [1, 1, nk]   top-k gate probabilities for expert e (f32)
      x_ref   : [nt, d]      all tokens of the whole batch (nt = n*t), resident
      w1_ref  : [1, d, tf]   f-tile of expert e's first projection
      w2_ref  : [1, tf, d]   f-tile of expert e's second projection
      o_ref   : [nt, d]      output, accumulated over experts (VMEM resident)
      xin_ref : [nk, d]      scratch: gathered tokens for expert e
      acc_ref : [nk, d]      f32 scratch: second projection accumulated over f
    """
    e = pl.program_id(0)
    fi = pl.program_id(1)

    nt = x_ref.shape[0]
    nk = idx_ref.shape[-1]

    @pl.when((e == 0) & (fi == 0))
    def _():
        o_ref[...] = jnp.zeros_like(o_ref)

    # --- Once per expert (first f-tile): gather the selected tokens. ---------
    @pl.when(fi == 0)
    def _():
        rows = jax.lax.broadcasted_iota(jnp.int32, (nt, nk), 0)
        # Transposed selection matrix, built in-kernel (no HBM one-hot):
        #   gather_t[c, r] = 1.0 if idx[r] == c else 0.0          [nt, nk]
        gather_t = (rows == idx_ref[0]).astype(x_ref.dtype)
        # xin[r, :] = x_flat[idx[r], :]  -- MXU consumes the transposed operand
        # directly (contraction over dim 0 of both), no transpose materialized.
        xin = jax.lax.dot_general(
            gather_t, x_ref[...],
            dimension_numbers=(((0,), (0,)), ((), ())),
            preferred_element_type=jnp.float32)                   # [nk, d]
        xin_ref[...] = xin.astype(xin_ref.dtype)
        acc_ref[...] = jnp.zeros_like(acc_ref)

    # --- Every f-tile:  acc += GELU(xin @ w1_tile) @ w2_tile  (f32 accum). ---
    h = jnp.dot(xin_ref[...], w1_ref[0],
                preferred_element_type=jnp.float32)               # [nk, tf] f32
    # Exact (erf) GELU, matching nn.GELU() default; kept in f32 (v5e-safe).
    h = 0.5 * h * (1.0 + jax.lax.erf(h * 0.7071067811865476))
    acc_ref[...] += jnp.dot(h.astype(w2_ref.dtype), w2_ref[0],
                            preferred_element_type=jnp.float32)   # [nk, d]

    # --- Last f-tile: gate-scale + scatter back, accumulate into output. ----
    @pl.when(fi == pl.num_programs(1) - 1)
    def _():
        rows = jax.lax.broadcasted_iota(jnp.int32, (nt, nk), 0)
        # Gate scaling folded into the scatter matrix (lane-dense broadcast):
        #   scatter_t[c, r] = g[r] * (idx[r] == c)                [nt, nk] f32
        scatter_t = jnp.where(rows == idx_ref[0], g_ref[0], 0.0)
        contrib = jnp.dot(scatter_t, acc_ref[...],
                          preferred_element_type=jnp.float32)     # [nt, d]
        o_ref[...] += contrib.astype(o_ref.dtype)


def _moe_pallas(idx, gate_p, x_flat, w1, w2, *, tile_f):
    E = w1.shape[0]
    d = x_flat.shape[-1]
    f = w1.shape[-1]
    nt = x_flat.shape[0]
    nk = idx.shape[-1]
    n_f_tiles = f // tile_f

    grid_spec = pltpu.PrefetchScalarGridSpec(
        num_scalar_prefetch=0,
        grid=(E, n_f_tiles),                       # expert outer, f-tile inner
        in_specs=[
            pl.BlockSpec((1, 1, nk), lambda e, fi: (e, 0, 0)),       # indices
            pl.BlockSpec((1, 1, nk), lambda e, fi: (e, 0, 0)),       # gates
            pl.BlockSpec((nt, d), lambda e, fi: (0, 0)),             # all tokens
            pl.BlockSpec((1, d, tile_f), lambda e, fi: (e, 0, fi)),  # w1 f-tile
            pl.BlockSpec((1, tile_f, d), lambda e, fi: (e, fi, 0)),  # w2 f-tile
        ],
        out_specs=pl.BlockSpec((nt, d), lambda e, fi: (0, 0)),
        scratch_shapes=[
            pltpu.VMEM((nk, d), x_flat.dtype),     # gathered tokens (per expert)
            pltpu.VMEM((nk, d), jnp.float32),      # f32 accumulator over f-tiles
        ],
    )
    # TODO(synk): on v7x (2 TensorCores) the grid has no "parallel" axis because
    # the single output block accumulates over experts; a parallel output-d tile
    # axis could be added to occupy both cores.
    return pl.pallas_call(
        _moe_kernel,
        out_shape=jax.ShapeDtypeStruct((nt, d), x_flat.dtype),
        grid_spec=grid_spec,
        compiler_params=pltpu.CompilerParams(
            dimension_semantics=("arbitrary", "arbitrary"),
            # Explicit budget; safe on all of v5e/v6e/v7x (re-derive per chip /
            # tile_f for large models — v7x has only 64 MiB physical VMEM).
            vmem_limit_bytes=48 * 1024 * 1024,
        ),
    )(idx, gate_p, x_flat, w1, w2)


@functools.partial(
    jax.jit, static_argnames=("num_experts", "expert_capacity", "tile_f"))
def feedforward_ec_moe(x, gate_w, w1, w2, *, num_experts, expert_capacity,
                       tile_f=None):
    """Expert-choice MoE FFN.  x: [n, t, d] -> [n, t, d]."""
    n, t, d = x.shape
    E = num_experts
    f = w1.shape[-1]
    k = int(expert_capacity * t / num_experts)

    # --- Gating (glue, plain JAX). ------------------------------------------
    # TODO(synk): softmax + top-k have no clean Pallas TPU equivalent; kept in JAX.
    scores = jnp.einsum("ntd,ed->nte", x, gate_w)                 # [n, t, E]
    probs = jax.nn.softmax(scores, axis=-1)
    g, m = jax.lax.top_k(jnp.transpose(probs, (0, 2, 1)), k)      # [n, E, k]

    # Fold the batch into the kernel: flat token index = b*t + token, so each
    # expert processes all n*k selected tokens with its weights loaded once.
    nk = n * k
    nk_pad = ((nk + 7) // 8) * 8                                  # sublane align
    idx = m.astype(jnp.int32) + (jnp.arange(n, dtype=jnp.int32) * t)[:, None, None]
    idx = jnp.transpose(idx, (1, 0, 2)).reshape(E, 1, nk)         # [E, 1, n*k]
    gate_p = jnp.transpose(g, (1, 0, 2)).reshape(E, 1, nk).astype(jnp.float32)
    if nk_pad != nk:
        # Pad with an out-of-range token index (never matches) and gate 0.
        idx = jnp.pad(idx, ((0, 0), (0, 0), (0, nk_pad - nk)),
                      constant_values=n * t)
        gate_p = jnp.pad(gate_p, ((0, 0), (0, 0), (0, nk_pad - nk)))

    x_flat = x.reshape(n * t, d)

    # Pick an f-tile that divides f (bounds VMEM; bigger tiles amortize the
    # ~0.35us per-grid-step overhead on v6e where VMEM is plentiful).
    if tile_f is None:
        tile_f = f
        for cand in (512, 256, 128):
            if f % cand == 0:
                tile_f = cand
                break
    assert f % tile_f == 0, "hidden_dim must be divisible by tile_f"

    out_flat = _moe_pallas(idx, gate_p, x_flat, w1, w2, tile_f=tile_f)
    return out_flat.reshape(n, t, d)


def _reference(x, gate_w, w1, w2, *, num_experts, expert_capacity):
    """Pure-JAX reference mirroring the PyTorch forward exactly."""
    n, t, d = x.shape
    k = int(expert_capacity * t / num_experts)
    scores = jnp.einsum("ntd,ed->nte", x, gate_w)
    probs = jax.nn.softmax(scores, axis=-1)
    g, m = jax.lax.top_k(jnp.transpose(probs, (0, 2, 1)), k)
    p = jax.nn.one_hot(m, t, dtype=jnp.float32)
    xin = jnp.einsum("nekt,ntd->nekd", p, x)
    h = jnp.einsum("nekd,edf->nekf", xin, w1)
    h = jax.nn.gelu(h, approximate=False)
    h = jnp.einsum("nekf,efd->nekd", h, w2)
    out = g[..., None] * h
    return jnp.einsum("nekt,nekd->ntd", p, out)


if __name__ == "__main__":
    # Module hyper-parameters (small, but lane-friendly: d, f multiples of 128).
    num_experts = 4
    expert_capacity = 2.0
    dim = 128
    hidden_dim_raw = 400
    multiple_of = 256
    hidden_dim = multiple_of * ((hidden_dim_raw + multiple_of - 1) // multiple_of)  # 512

    n, t = 2, 16  # -> k = 8 tokens per expert, n*k = 16

    key = jax.random.PRNGKey(0)
    kx, kg, k1, k2 = jax.random.split(key, 4)
    x = jax.random.normal(kx, (n, t, dim), dtype=jnp.float32)
    gate_w = 0.02 * jax.random.normal(kg, (num_experts, dim), dtype=jnp.float32)
    w1 = 0.02 * jax.random.normal(k1, (num_experts, dim, hidden_dim), dtype=jnp.float32)
    w2 = 0.02 * jax.random.normal(k2, (num_experts, hidden_dim, dim), dtype=jnp.float32)

    # tile_f=256 -> two f-tiles, exercising the f-accumulation path.
    out = feedforward_ec_moe(
        x, gate_w, w1, w2,
        num_experts=num_experts, expert_capacity=expert_capacity, tile_f=256,
    )
    out = jax.block_until_ready(out)

    ref = _reference(
        x, gate_w, w1, w2,
        num_experts=num_experts, expert_capacity=expert_capacity,
    )
    assert out.shape == (n, t, dim)
    max_diff = jnp.max(jnp.abs(out - ref))
    assert jnp.allclose(out, ref, atol=1e-4, rtol=1e-4), (
        f"max abs diff = {max_diff}"
    )
    print("KERNEL_OK")
</pallas_src>

<mosaic_0001>
module attributes {stable_mosaic.version = 11 : i64} {
  func.func @_moe_kernel(%arg0: i32, %arg1: i32, %arg2: memref<1x1x16xi32, #tpu.memory_space<vmem>>, %arg3: memref<1x1x16xf32, #tpu.memory_space<vmem>>, %arg4: memref<32x128xf32, #tpu.memory_space<vmem>>, %arg5: memref<1x128x256xf32, #tpu.memory_space<vmem>>, %arg6: memref<1x256x128xf32, #tpu.memory_space<vmem>>, %arg7: memref<32x128xf32, #tpu.memory_space<vmem>>, %arg8: memref<16x128xf32, #tpu.memory_space<vmem>>, %arg9: memref<16x128xf32, #tpu.memory_space<vmem>>) attributes {dimension_semantics = [#tpu.dimension_semantics<arbitrary>, #tpu.dimension_semantics<arbitrary>], iteration_bounds = array<i64: 4, 2>, scalar_prefetch = 0 : i64, scratch_operands = 2 : i64, tpu.core_type = #tpu.core_type<tc>, window_params = [{transform_indices = @transform_0, window_bounds = array<i64: 1, 1, 16>}, {transform_indices = @transform_1, window_bounds = array<i64: 1, 1, 16>}, {pipeline_mode = #tpu.pipeline_mode<synchronous>, transform_indices = @transform_2, window_bounds = array<i64: 32, 128>}, {transform_indices = @transform_3, window_bounds = array<i64: 1, 128, 256>}, {transform_indices = @transform_4, window_bounds = array<i64: 1, 256, 128>}, {pipeline_mode = #tpu.pipeline_mode<synchronous>, transform_indices = @transform_5, window_bounds = array<i64: 32, 128>}]} {
    %c0_i32 = arith.constant 0 : i32
    %0 = arith.cmpi eq, %arg0, %c0_i32 : i32
    %c0_i32_0 = arith.constant 0 : i32
    %1 = arith.cmpi eq, %arg1, %c0_i32_0 : i32
    %2 = arith.andi %0, %1 : i1
    %3 = arith.extui %2 : i1 to i32
    %c0_i32_1 = arith.constant 0 : i32
    %4 = arith.cmpi ne, %3, %c0_i32_1 : i32
    scf.if %4 {
      %cst_20 = arith.constant 0.000000e+00 : f32
      %29 = vector.broadcast %cst_20 : f32 to vector<32x128xf32>
      %c0_21 = arith.constant 0 : index
      %c0_22 = arith.constant 0 : index
      %30 = vector.load %arg7[%c0_21, %c0_22] : memref<32x128xf32, #tpu.memory_space<vmem>>, vector<32x128xf32>
      tpu.vector_store %arg7[%c0_21, %c0_22], %29 {strides = array<i32>} : memref<32x128xf32, #tpu.memory_space<vmem>>, vector<32x128xf32>,
    } else {
    }
    %c0_i32_2 = arith.constant 0 : i32
    %5 = arith.cmpi eq, %arg1, %c0_i32_2 : i32
    %6 = arith.extui %5 : i1 to i32
    %c0_i32_3 = arith.constant 0 : i32
    %7 = arith.cmpi ne, %6, %c0_i32_3 : i32
    scf.if %7 {
      %29 = tpu.iota {dimensions = array<i32: 0>} : vector<32x16xi32>
      %c0_20 = arith.constant 0 : index
      %c0_21 = arith.constant 0 : index
      %c0_22 = arith.constant 0 : index
      %30 = vector.load %arg2[%c0_20, %c0_21, %c0_22] : memref<1x1x16xi32, #tpu.memory_space<vmem>>, vector<1x1x16xi32>
      %31 = vector.shape_cast %30 : vector<1x1x16xi32> to vector<1x16xi32>
      %32 = vector.broadcast %31 : vector<1x16xi32> to vector<32x16xi32>
      %33 = arith.cmpi eq, %29, %32 : vector<32x16xi32>
      %34 = arith.extui %33 : vector<32x16xi1> to vector<32x16xi32>
      %35 = arith.sitofp %34 : vector<32x16xi32> to vector<32x16xf32>
      %c0_23 = arith.constant 0 : index
      %c0_24 = arith.constant 0 : index
      %36 = vector.load %arg4[%c0_23, %c0_24] : memref<32x128xf32, #tpu.memory_space<vmem>>, vector<32x128xf32>
      %cst_25 = arith.constant dense<0.000000e+00> : vector<16x128xf32>
      %37 = tpu.matmul %35, %36, %cst_25 {dimension_numbers = #tpu.dot_dimension_numbers<[0], [0], [1], [1], [0, 1, 1, 1], [], []>} : vector<32x16xf32>, vector<32x128xf32>, vector<16x128xf32> -> vector<16x128xf32>
      %c0_26 = arith.constant 0 : index
      %c0_27 = arith.constant 0 : index
      %38 = vector.load %arg8[%c0_26, %c0_27] : memref<16x128xf32, #tpu.memory_space<vmem>>, vector<16x128xf32>
      tpu.vector_store %arg8[%c0_26, %c0_27], %37 {strides = array<i32>} : memref<16x128xf32, #tpu.memory_space<vmem>>, vector<16x128xf32>,
      %cst_28 = arith.constant 0.000000e+00 : f32
      %39 = vector.broadcast %cst_28 : f32 to vector<16x128xf32>
      %c0_29 = arith.constant 0 : index
      %c0_30 = arith.constant 0 : index
      %40 = vector.load %arg9[%c0_29, %c0_30] : memref<16x128xf32, #tpu.memory_space<vmem>>, vector<16x128xf32>
      tpu.vector_store %arg9[%c0_29, %c0_30], %39 {strides = array<i32>} : memref<16x128xf32, #tpu.memory_space<vmem>>, vector<16x128xf32>,
    } else {
    }
    %c0 = arith.constant 0 : index
    %c0_4 = arith.constant 0 : index
    %8 = vector.load %arg8[%c0, %c0_4] : memref<16x128xf32, #tpu.memory_space<vmem>>, vector<16x128xf32>
    %c0_5 = arith.constant 0 : index
    %c0_6 = arith.constant 0 : index
    %c0_7 = arith.constant 0 : index
    %9 = vector.load %arg5[%c0_5, %c0_6, %c0_7] : memref<1x128x256xf32, #tpu.memory_space<vmem>>, vector<1x128x256xf32>
    %10 = vector.shape_cast %9 : vector<1x128x256xf32> to vector<128x256xf32>
    %cst = arith.constant dense<0.000000e+00> : vector<16x256xf32>
    %11 = tpu.matmul %8, %10, %cst {dimension_numbers = #tpu.dot_dimension_numbers<[1], [0], [0], [1], [0, 0, 1, 1], [], []>} : vector<16x128xf32>, vector<128x256xf32>, vector<16x256xf32> -> vector<16x256xf32>
    %cst_8 = arith.constant 5.000000e-01 : f32
    %12 = vector.broadcast %cst_8 : f32 to vector<16x256xf32>
    %13 = arith.mulf %12, %11 : vector<16x256xf32>
    %cst_9 = arith.constant 0.707106769 : f32
    %14 = vector.broadcast %cst_9 : f32 to vector<16x256xf32>
    %15 = arith.mulf %11, %14 : vector<16x256xf32>
    %16 = math.erf %15 : vector<16x256xf32>
    %cst_10 = arith.constant 1.000000e+00 : f32
    %17 = vector.broadcast %cst_10 : f32 to vector<16x256xf32>
    %18 = arith.addf %17, %16 : vector<16x256xf32>
    %19 = arith.mulf %13, %18 : vector<16x256xf32>
    %c0_11 = arith.constant 0 : index
    %c0_12 = arith.constant 0 : index
    %20 = vector.load %arg9[%c0_11, %c0_12] : memref<16x128xf32, #tpu.memory_space<vmem>>, vector<16x128xf32>
    %c0_13 = arith.constant 0 : index
    %c0_14 = arith.constant 0 : index
    %c0_15 = arith.constant 0 : index
    %21 = vector.load %arg6[%c0_13, %c0_14, %c0_15] : memref<1x256x128xf32, #tpu.memory_space<vmem>>, vector<1x256x128xf32>
    %22 = vector.shape_cast %21 : vector<1x256x128xf32> to vector<256x128xf32>
    %cst_16 = arith.constant dense<0.000000e+00> : vector<16x128xf32>
    %23 = tpu.matmul %19, %22, %cst_16 {dimension_numbers = #tpu.dot_dimension_numbers<[1], [0], [0], [1], [0, 0, 1, 1], [], []>} : vector<16x256xf32>, vector<256x128xf32>, vector<16x128xf32> -> vector<16x128xf32>
    %24 = arith.addf %20, %23 : vector<16x128xf32>
    %c0_17 = arith.constant 0 : index
    %c0_18 = arith.constant 0 : index
    %25 = vector.load %arg9[%c0_17, %c0_18] : memref<16x128xf32, #tpu.memory_space<vmem>>, vector<16x128xf32>
    tpu.vector_store %arg9[%c0_17, %c0_18], %24 {strides = array<i32>} : memref<16x128xf32, #tpu.memory_space<vmem>>, vector<16x128xf32>,
    %c1_i32 = arith.constant 1 : i32
    %26 = arith.cmpi eq, %arg1, %c1_i32 : i32
    %27 = arith.extui %26 : i1 to i32
    %c0_i32_19 = arith.constant 0 : i32
    %28 = arith.cmpi ne, %27, %c0_i32_19 : i32
    scf.if %28 {
      %29 = tpu.iota {dimensions = array<i32: 0>} : vector<32x16xi32>
      %c0_20 = arith.constant 0 : index
      %c0_21 = arith.constant 0 : index
      %c0_22 = arith.constant 0 : index
      %30 = vector.load %arg2[%c0_20, %c0_21, %c0_22] : memref<1x1x16xi32, #tpu.memory_space<vmem>>, vector<1x1x16xi32>
      %31 = vector.shape_cast %30 : vector<1x1x16xi32> to vector<1x16xi32>
      %32 = vector.broadcast %31 : vector<1x16xi32> to vector<32x16xi32>
      %33 = arith.cmpi eq, %29, %32 : vector<32x16xi32>
      %c0_23 = arith.constant 0 : index
      %c0_24 = arith.constant 0 : index
      %c0_25 = arith.constant 0 : index
      %34 = vector.load %arg3[%c0_23, %c0_24, %c0_25] : memref<1x1x16xf32, #tpu.memory_space<vmem>>, vector<1x1x16xf32>
      %35 = vector.shape_cast %34 : vector<1x1x16xf32> to vector<1x16xf32>
      %cst_26 = arith.constant 0.000000e+00 : f32
      %36 = vector.shape_cast %35 : vector<1x16xf32> to vector<1x16xf32>
      %37 = vector.broadcast %36 : vector<1x16xf32> to vector<32x16xf32>
      %38 = vector.broadcast %cst_26 : f32 to vector<32x16xf32>
      %39 = arith.select %33, %37, %38 : vector<32x16xi1>, vector<32x16xf32>
      %c0_27 = arith.constant 0 : index
      %c0_28 = arith.constant 0 : index
      %40 = vector.load %arg9[%c0_27, %c0_28] : memref<16x128xf32, #tpu.memory_space<vmem>>, vector<16x128xf32>
      %cst_29 = arith.constant dense<0.000000e+00> : vector<32x128xf32>
      %41 = tpu.matmul %39, %40, %cst_29 {dimension_numbers = #tpu.dot_dimension_numbers<[1], [0], [0], [1], [0, 0, 1, 1], [], []>} : vector<32x16xf32>, vector<16x128xf32>, vector<32x128xf32> -> vector<32x128xf32>
      %c0_30 = arith.constant 0 : index
      %c0_31 = arith.constant 0 : index
      %42 = vector.load %arg7[%c0_30, %c0_31] : memref<32x128xf32, #tpu.memory_space<vmem>>, vector<32x128xf32>
      %43 = arith.addf %42, %41 : vector<32x128xf32>
      %c0_32 = arith.constant 0 : index
      %c0_33 = arith.constant 0 : index
      %44 = vector.load %arg7[%c0_32, %c0_33] : memref<32x128xf32, #tpu.memory_space<vmem>>, vector<32x128xf32>
      tpu.vector_store %arg7[%c0_32, %c0_33], %43 {strides = array<i32>} : memref<32x128xf32, #tpu.memory_space<vmem>>, vector<32x128xf32>,
    } else {
    }
    return
  }
  func.func @transform_0(%arg0: i32, %arg1: i32) -> (i32, i32, i32) {
    %c0_i32 = arith.constant 0 : i32
    %c0_i32_0 = arith.constant 0 : i32
    %c0_i32_1 = arith.constant 0 : i32
    return %arg0, %c0_i32, %c0_i32_0 : i32, i32, i32
  }
  func.func @transform_1(%arg0: i32, %arg1: i32) -> (i32, i32, i32) {
    %c0_i32 = arith.constant 0 : i32
    %c0_i32_0 = arith.constant 0 : i32
    %c0_i32_1 = arith.constant 0 : i32
    return %arg0, %c0_i32, %c0_i32_0 : i32, i32, i32
  }
  func.func @transform_2(%arg0: i32, %arg1: i32) -> (i32, i32) {
    %c0_i32 = arith.constant 0 : i32
    %c0_i32_0 = arith.constant 0 : i32
    %c0_i32_1 = arith.constant 0 : i32
    return %c0_i32, %c0_i32_0 : i32, i32
  }
  func.func @transform_3(%arg0: i32, %arg1: i32) -> (i32, i32, i32) {
    %c0_i32 = arith.constant 0 : i32
    %c0_i32_0 = arith.constant 0 : i32
    return %arg0, %c0_i32, %arg1 : i32, i32, i32
  }
  func.func @transform_4(%arg0: i32, %arg1: i32) -> (i32, i32, i32) {
    %c0_i32 = arith.constant 0 : i32
    %c0_i32_0 = arith.constant 0 : i32
    return %arg0, %arg1, %c0_i32 : i32, i32, i32
  }
  func.func @transform_5(%arg0: i32, %arg1: i32) -> (i32, i32) {
    %c0_i32 = arith.constant 0 : i32
    %c0_i32_0 = arith.constant 0 : i32
    %c0_i32_1 = arith.constant 0 : i32
    return %c0_i32, %c0_i32_0 : i32, i32
  }
}

</mosaic_0001>

<bundles_post_ra>
// kernel: feedforward_ec_moe.1
= control target key start
LH: loop header
LB: loop body
LE: loop exit
PB: predicated region body
PF: predicated region fallthrough
CT: control target
= control target key end

     0   :  { %s1662_s0 = inlined_call_operand.vmem [shape: s32[4,1,16], index: 0, kind: input, shape index: {}]   ;;  %s1663_s1 = inlined_call_operand.vmem [shape: f32[4,1,16], index: 1, kind: input, shape index: {}]   ;;  %s1664_s2 = inlined_call_operand.vmem [shape: f32[32,128], index: 2, kind: input, shape index: {}]   ;;  %s1665_s3 = inlined_call_operand.hbm [shape: f32[4,128,512], index: 3, kind: input, shape index: {}]   ;;  %s1666_s4 = inlined_call_operand.hbm [shape: f32[4,512,128], index: 4, kind: input, shape index: {}]   ;;  %s1667_s5 = inlined_call_operand.hbm [shape: f32[32,128], index: 5, kind: output, shape index: {}]  }
   0x1   :  { %1673 = sst [smem:[#allocation18_spill]] %s1665_s3 }
   0x2   :  { %10 = vsyncpa [#allocation5], 0 }
   0x3   :  { %12 = vsyncpa [#allocation5 + $0x1], 0 }
   0x4   :  { %13 = vsyncpa [#allocation8], 0 }
   0x5   :  { %15 = vsyncpa [#allocation8 + $0x1], 0 }
   0x6   :  { %16 = vsyncpa [#allocation6], 0  ;;  %s1317_s18 = smov 0   ;;  %s1319_s19 = smov 0  }
   0x7   :  { %s1321_s20 = smov 0   ;;  %s1323_s21 = smov 0  }
   0x8   :  { %s1325_s22 = smov 0   ;;  %s1327_s23 = smov 0  }
   0x9   :  { %s1329_s24 = smov 0   ;;  %s1331_s25 = smov 0  }
   0xa LB: > { %1674 = sst [smem:[#allocation13_spill]] %s1255_s20  ;;  %s1668_s26 = sadd.s32 4294967295, %s1275_s25   ;;  %s1275_s25 = sphi %s1331_s25, %s22_s25   ;;  %s1271_s24 = sphi %s1329_s24, %s1689_s24   ;;  %s1267_s23 = sphi %s1327_s23, %s1693_s23   ;;  %s1263_s22 = sphi %s1325_s22, %s1687_s22   ;;  %s1259_s21 = sphi %s1323_s21, %s1692_s21   ;;  %s1255_s20 = sphi %s1321_s20, %s1686_s20   ;;  %s1251_s19 = sphi %s1319_s19, %s1691_s19   ;;  %s1247_s18 = sphi %s1317_s18, %s1690_s18  }
   0xb   : > { %1675 = sst [smem:[#allocation14_spill]] %s1271_s24  ;;  %s31_s27 = sadd.s32 1, %s1267_s23 }
   0xc   : > { %p32_p0 = scmp.ge.s32.totalorder %s31_s27, 2  ;;  %s34_s28 = sadd.s32 1, %s1271_s24 }
   0xd   : > { %s116_s29 = sadd.s32 1, %s1255_s20  ;;  %p123_p1 = scmp.ne.s32.totalorder %s1255_s20, %s1251_s19 }
   0xe   : > { %s1695_s27 = smov (%p32_p0, %s31_s27), 0  ;;  %s1697_s28 = smov (!%p32_p0, %s34_s28), %s1271_s24 }
   0xf   : > { %1676 = sst [smem:[#allocation15_spill]] %s1695_s27  ;;  %s112_s30 = ssub.s32 %s1267_s23, %s1695_s27 }
  0x10   : > { %p124_p2 = scmp.eq.s32.totalorder %s1275_s25, 0  ;;  %p36_p3 = scmp.ge.s32.totalorder %s1697_s28, 4 }
  0x11   : > { %p129_p4 = scmp.ne.s32.totalorder %s1251_s19, %s1247_s18  ;;  %p130_p6 = scmp.eq.s32.totalorder %s1668_s26, 0 }
  0x12   : > { %p1368_p5 = por %p124_p2, %p123_p1  ;;  %s1699_s28 = smov (%p36_p3, %s1697_s28), 0 }
  0x13   : > { %1678 = sst [smem:[#allocation16_spill]] %s1699_s28  ;;  %p1376_p7 = por %p130_p6, %p129_p4 }
  0x14   : > { %s111_s8 = ssub.s32 %s1271_s24, %s1699_s28  ;;  %p1025_p8 = scmp.lt.s32.totalorder %s1275_s25, 8 }
  0x15   : > { %s113_s9 = sor.u32 %s112_s30, %s111_s8  ;;  %s1384_s10 = sand.u32 1, %s1255_s20  }
  0x16   : > { %p114_p9 = scmp.eq.s32.totalorder %s113_s9, 0  ;;  %s969_s11 = sshll.u32 %s1384_s10, 8 }
  0x17   : > { %s970_s12 = sshll.u32 %s1267_s23, 1  ;;  %s971_s14 = sshll.u32 %s1271_s24, 6 }
  0x18   : > { %s1389_s13 = scalar_select %p114_p9, %s1255_s20, %s116_s29  }
  0x19   : > { %s226_s15 = sadd.s32 %s971_s14, %s970_s12  ;;  %s221_s16 = scalar_lea.vmem [#allocation4], %s969_s11 }
  0x1a   : > { %1680 = sst [smem:[#allocation17_spill]] %s1389_s13  ;;  %s231_s17 = sshll.u32 %s221_s16, 4  ;;  %s232_s17 = int_to_ptr.vmem [resolvable:$true] %s231_s17 }
  0x1b   : > { %s972_s18 = sshll.u32 %s226_s15, 3  ;;  %s1681_s3 = sld [smem:[#allocation18_spill]] }
  0x1c   : > { %p1399_p10 = pnand %p1025_p8, %p1368_p5  ;;  %s218_s28 = scalar_lea.sflag [#allocation5], %s1384_s10 }
  0x1d   : > { %s1277_s12 = smov 512   ;;  %s1278_s27 = smov 256  }
  0x1e   : > { %s1279_s16 = smov 16   ;;  %p977_p11 = scmp.ge.s32.totalorder %s1275_s25, 1 }
  0x1f   : > { %p263_p12 = scmp.lt.s32.totalorder %s1275_s25, 9  ;;  %s974_s6 = sshll.u32 %s1267_s23, 5 }
  0x20   : > { %s250_s15 = sadd.s32 %s974_s6, %s971_s14 }
  0x21   : > { %s228_s8 = scalar_lea.hbm %s1681_s3, %s972_s18  ;;  %p1408_p13 = pnand %p977_p11, %p263_p12 }
  0x22   : > { %s229_s29 = sshll.u32 %s228_s8, 4  ;;  %s245_s18 = scalar_lea.vmem [#allocation7], %s969_s11  ;;  %s230_s29 = int_to_ptr.hbm [resolvable:$true] %s229_s29 }
  0x23   : > { %1021 = dma.hbm_to_vmem [thread:$0]  (!%p1399_p10), %s230_s29, 4096, %s232_s17, %s218_s28, %s1277_s12, %s1278_s27, %s1279_s16  }
  0x24   : > { %s255_s30 = sshll.u32 %s245_s18, 4  ;;  %s976_s8 = sshll.u32 %s250_s15, 3  ;;  %s256_s30 = int_to_ptr.vmem [resolvable:$true] %s255_s30 }
  0x25   : > { %s252_s13 = scalar_lea.hbm %s1666_s4, %s976_s8  ;;  %s242_s27 = scalar_lea.sflag [#allocation8], %s1384_s10 }
  0x26   : > { %s253_s20 = sshll.u32 %s252_s13, 4  ;;  %s1280_s28 = smov 128   ;;  %s254_s20 = int_to_ptr.hbm [resolvable:$true] %s253_s20 }
  0x27   : > { %s1281_s17 = smov 8   ;;  %267 = sbr.rel (%p1408_p13) target bundleno = 886 (0x376), region = 40 }
  0x28   : > { %1024 = dma.hbm_to_vmem [thread:$0]  (!%p1399_p10), %s254_s20, 4096, %s256_s30, %s242_s27, %s1280_s28, %s1280_s28, %s1281_s17  }
  0x29   : > { %s269_s11 = sand.u32 (!%p1408_p13), 1, %s1251_s19  }
  0x2a   : > { %s978_s14 = sshll.u32 (!%p1408_p13), %s269_s11, 8  ;;  %s270_s29 = scalar_lea.sflag (!%p1408_p13), [#allocation5], %s269_s11 }
  0x2b   : > { %s1422_s12 = scalar_lea.vmem (!%p1408_p13), [#allocation4], %s978_s14 }
  0x2c   : > { %1234 = dma.done.wait (%p1376_p7), %s270_s29, 4096  }
  0x2d   : > { %1236 = vsyncadd (%p1376_p7), %s270_s29, 4294963200  ;;  %s280_s3 = scalar_lea.sflag [#allocation8], %s269_s11  ;;  %s1428_s24 = scalar_lea.vmem [#allocation7], %s978_s14 }
  0x2e   : > { %1238 = dma.done.wait (%p1376_p7), %s280_s3, 4096  }
  0x2f   : > { %1240 = vsyncadd (%p1376_p7), %s280_s3, 4294963200  ;;  %p317_p0 = scmp.lt.s32.totalorder %s1263_s22, 3  ;;  %p325_p1 = scmp.eq.s32.totalorder %s1263_s22, 0 }
  0x30   : > { %p326_p2 = scmp.eq.s32.totalorder %s1259_s21, 0 }
  0x31   : > { %s1701_s22 = smov (!%p317_p0, %s1263_s22), 3 }
  0x32   : > { %p327_p3 = pnand %p326_p2, %p325_p1  ;;  %s1444_s13 = scalar_lea.vmem %s1662_s0, %s1701_s22 }
  0x33   : > { %s322_s16 = scalar_lea.vmem %s1663_s1, %s1701_s22 }
  0x34   : > { %330 = sbr.rel (%p327_p3) target bundleno = 62 (0x3e), region = 52 }
  0x39   : > { %v1282_v0 = vmov 0.0  }
  0x3a   : > { %331 = vst [vmem:[#allocation9] sm:$0xff] %v1282_v0 }
  0x3b   : > { %332 = vst [vmem:[#allocation9 + $0x8] sm:$0xff] %v1282_v0 }
  0x3c   : > { %333 = vst [vmem:[#allocation9 + $0x10] sm:$0xff] %v1282_v0 }
  0x3d   : > { %334 = vst [vmem:[#allocation9 + $0x18] sm:$0xff] %v1282_v0 }
  0x3e PF: > { %p980_p4 = scmp.ne.s32.totalorder %s1259_s21, 0 }
  0x40   : > { %337 = sbr.rel (%p980_p4) target bundleno = 375 (0x177), region = 56 }
  0x45   : > { %v338_v1 = vlaneseq  ;;  %v1102_v2 = vld [vmem:[%s1444_s13] ss:$0 sm:$0xff]  ;;  %v360_v3 = vld [vmem:[%s1664_s2 + $0x18] sm:$0xff]  ;;  %v1283_v4 = vmov 0.0   ;;  %v359_v5 = vld [vmem:[%s1664_s2 + $0x10] sm:$0xff]  ;;  %vm393_vm4 = vcmask 261120  }
  0x46   : > { %425 = vst [vmem:[#allocation3 + $0x8] sm:$0xff] %v1283_v4  ;;  %412 = vmatpush.msra.mxu0 %v360_v3  ;;  %1000 = vmatpush.msra.mxu1 %v360_v3  ;;  %v358_v7 = vld [vmem:[%s1664_s2 + $0x8] sm:$0xff]  ;;  %v357_v9 = vld [vmem:[%s1664_s2] sm:$0xff] }
  0x47   : > { %v339_v6 = vshrl.u32 %v338_v1, 7  ;;  %426 = vst [vmem:[#allocation3] sm:$0xff] %v1283_v4 }
  0x48   : > { %413 = vmatpush.msra.mxu0 %v359_v5  ;;  %1001 = vmatpush.msra.mxu1 %v359_v5 }
  0x49   : > { %vm345_vm0 = vcmp.eq.s32.totalorder %v339_v6, %v1102_v2  ;;  %v340_v8 = vadd.s32 8, %v339_v6  ;;  %v341_v12 = vadd.s32 16, %v339_v6  ;;  %v342_v14 = vadd.s32 24, %v339_v6 }
  0x4a   : > { %v981_v10 = vsel %vm345_vm0, 1.0, %v1283_v4  ;;  %414 = vmatpush.msra.mxu0 %v358_v7  ;;  %1002 = vmatpush.msra.mxu1 %v358_v7 }
  0x4b   : > { %361 = vxpose.xlu0.b32.start [1/4] (short) (narrow) %v981_v10, 16  ;;  %vm346_vm1 = vcmp.eq.s32.totalorder %v340_v8, %v1102_v2  ;;  %vm347_vm2 = vcmp.eq.s32.totalorder %v341_v12, %v1102_v2  ;;  %vm348_vm3 = vcmp.eq.s32.totalorder %v342_v14, %v1102_v2 }
  0x4c   : > { %415 = vmatpush.msra.mxu0 %v357_v9  ;;  %1003 = vmatpush.msra.mxu1 %v357_v9  ;;  %v982_v11 = vsel %vm346_vm1, 1.0, %v1283_v4  ;;  %v983_v13 = vsel %vm347_vm2, 1.0, %v1283_v4  ;;  %v984_v15 = vsel %vm348_vm3, 1.0, %v1283_v4 }
  0x53   : > { %362 = vxpose.xlu0.b32.cont [2/4] (short) (narrow) %v982_v11, 16 }
  0x5b   : > { %363 = vxpose.xlu0.b32.cont [3/4] (short) (narrow) %v983_v13, 16 }
  0x63   : > { %364 = vxpose.xlu0.b32.end [4/4] (short) (narrow) %v984_v15, 16 }
  0xef   : > { %v377_v16 = vpop.trf.xlu0 }
  0xf0   : > { %985 = vmatmul.msk.f32.vlgmr.msra.gmra.mxu0 %vm393_vm4, %v377_v16 }
  0xf7   : > { %v378_v17 = vpop.trf.xlu0 }
  0xf8   : > { %986 = vmatmul.msk.f32.vlgmr.msra.gmra.mxu1 %vm393_vm4, %v378_v17 }
 0x16d   : > { %v417_v18 = vpop.f32.mrf.mxu0 }
 0x16e   : > { %423 = vst [vmem:[#allocation2] sm:$0xff] %v417_v18 }
 0x175   : > { %v420_v19 = vpop.f32.mrf.mxu1 }
 0x176   : > { %424 = vst [vmem:[#allocation2 + $0x8] sm:$0xff] %v420_v19 }
 0x177 PF: > { %v459_v20 = vld [vmem:[%s1422_s12 + $0xf0] sm:$0xff]  ;;  %v460_v21 = vld [vmem:[%s1422_s12 + $0xf8] sm:$0xff]  ;;  %v457_v22 = vld [vmem:[%s1422_s12 + $0xe0] sm:$0xff]  ;;  %p991_p5 = scmp.ne.s32.totalorder %s1259_s21, 1 }
 0x178   : > { %461 = vmatpush.msra.mxu0 %v459_v20  ;;  %484 = vmatpush.msra.mxu1 %v460_v21  ;;  %v458_v23 = vld [vmem:[%s1422_s12 + $0xe8] sm:$0xff]  ;;  %v455_v24 = vld [vmem:[%s1422_s12 + $0xd0] sm:$0xff]  ;;  %v456_v25 = vld [vmem:[%s1422_s12 + $0xd8] sm:$0xff] }
 0x179   : > { %v453_v26 = vld [vmem:[%s1422_s12 + $0xc0] sm:$0xff]  ;;  %v454_v27 = vld [vmem:[%s1422_s12 + $0xc8] sm:$0xff]  ;;  %v451_v28 = vld [vmem:[%s1422_s12 + $0xb0] sm:$0xff] }
 0x17a   : > { %462 = vmatpush.msra.mxu0 %v457_v22  ;;  %485 = vmatpush.msra.mxu1 %v458_v23  ;;  %v452_v29 = vld [vmem:[%s1422_s12 + $0xb8] sm:$0xff]  ;;  %v449_v30 = vld [vmem:[%s1422_s12 + $0xa0] sm:$0xff]  ;;  %v450_v31 = vld [vmem:[%s1422_s12 + $0xa8] sm:$0xff] }
 0x17b   : > { %v447_v32 = vld [vmem:[%s1422_s12 + $0x90] sm:$0xff]  ;;  %v448_v33 = vld [vmem:[%s1422_s12 + $0x98] sm:$0xff]  ;;  %v445_v34 = vld [vmem:[%s1422_s12 + $0x80] sm:$0xff] }
 0x17c   : > { %463 = vmatpush.msra.mxu0 %v455_v24  ;;  %486 = vmatpush.msra.mxu1 %v456_v25  ;;  %v446_v35 = vld [vmem:[%s1422_s12 + $0x88] sm:$0xff]  ;;  %v443_v36 = vld [vmem:[%s1422_s12 + $0x70] sm:$0xff]  ;;  %v444_v37 = vld [vmem:[%s1422_s12 + $0x78] sm:$0xff] }
 0x17d   : > { %v441_v38 = vld [vmem:[%s1422_s12 + $0x60] sm:$0xff]  ;;  %v442_v39 = vld [vmem:[%s1422_s12 + $0x68] sm:$0xff]  ;;  %v439_v40 = vld [vmem:[%s1422_s12 + $0x50] sm:$0xff] }
 0x17e   : > { %464 = vmatpush.msra.mxu0 %v453_v26  ;;  %487 = vmatpush.msra.mxu1 %v454_v27  ;;  %v440_v41 = vld [vmem:[%s1422_s12 + $0x58] sm:$0xff]  ;;  %v437_v42 = vld [vmem:[%s1422_s12 + $0x40] sm:$0xff]  ;;  %v438_v43 = vld [vmem:[%s1422_s12 + $0x48] sm:$0xff] }
 0x17f   : > { %v435_v44 = vld [vmem:[%s1422_s12 + $0x30] sm:$0xff]  ;;  %v436_v45 = vld [vmem:[%s1422_s12 + $0x38] sm:$0xff]  ;;  %v433_v46 = vld [vmem:[%s1422_s12 + $0x20] sm:$0xff] }
 0x180   : > { %465 = vmatpush.msra.mxu0 %v451_v28  ;;  %488 = vmatpush.msra.mxu1 %v452_v29  ;;  %v434_v47 = vld [vmem:[%s1422_s12 + $0x28] sm:$0xff]  ;;  %v431_v48 = vld [vmem:[%s1422_s12 + $0x10] sm:$0xff]  ;;  %v432_v49 = vld [vmem:[%s1422_s12 + $0x18] sm:$0xff] }
 0x181   : > { %v429_v50 = vld [vmem:[%s1422_s12] sm:$0xff]  ;;  %v430_v51 = vld [vmem:[%s1422_s12 + $0x8] sm:$0xff]  ;;  %v700_v54 = vld [vmem:[%s1428_s24 + $0x78] sm:$0xff] }
 0x182   : > { %466 = vmatpush.msra.mxu0 %v449_v30  ;;  %489 = vmatpush.msra.mxu1 %v450_v31  ;;  %v427_v52 = vld [vmem:[#allocation2] sm:$0xff]  ;;  %v428_v53 = vld [vmem:[#allocation2 + $0x8] sm:$0xff]  ;;  %v716_v55 = vld [vmem:[%s1428_s24 + $0xf8] sm:$0xff] }
 0x183   : > { %717 = vmatpush.msra.mxu2 %v700_v54  ;;  %740 = vmatpush.msra.mxu3 %v716_v55  ;;  %v699_v56 = vld [vmem:[%s1428_s24 + $0x70] sm:$0xff]  ;;  %v698_v58 = vld [vmem:[%s1428_s24 + $0x68] sm:$0xff]  ;;  %v697_v60 = vld [vmem:[%s1428_s24 + $0x60] sm:$0xff] }
 0x184   : > { %467 = vmatpush.msra.mxu0 %v447_v32  ;;  %490 = vmatpush.msra.mxu1 %v448_v33  ;;  %v715_v57 = vld [vmem:[%s1428_s24 + $0xf0] sm:$0xff]  ;;  %v714_v59 = vld [vmem:[%s1428_s24 + $0xe8] sm:$0xff]  ;;  %v713_v61 = vld [vmem:[%s1428_s24 + $0xe0] sm:$0xff] }
 0x185   : > { %718 = vmatpush.msra.mxu2 %v699_v56  ;;  %741 = vmatpush.msra.mxu3 %v715_v57  ;;  %v696_v62 = vld [vmem:[%s1428_s24 + $0x58] sm:$0xff]  ;;  %v695_v0 = vld [vmem:[%s1428_s24 + $0x50] sm:$0xff]  ;;  %v694_v6 = vld [vmem:[%s1428_s24 + $0x48] sm:$0xff] }
 0x186   : > { %468 = vmatpush.msra.mxu0 %v445_v34  ;;  %491 = vmatpush.msra.mxu1 %v446_v35  ;;  %v712_v63 = vld [vmem:[%s1428_s24 + $0xd8] sm:$0xff]  ;;  %v711_v1 = vld [vmem:[%s1428_s24 + $0xd0] sm:$0xff]  ;;  %v710_v7 = vld [vmem:[%s1428_s24 + $0xc8] sm:$0xff] }
 0x187   : > { %719 = vmatpush.msra.mxu2 %v698_v58  ;;  %742 = vmatpush.msra.mxu3 %v714_v59  ;;  %v693_v10 = vld [vmem:[%s1428_s24 + $0x40] sm:$0xff]  ;;  %v692_v12 = vld [vmem:[%s1428_s24 + $0x38] sm:$0xff]  ;;  %v691_v16 = vld [vmem:[%s1428_s24 + $0x30] sm:$0xff] }
 0x188   : > { %469 = vmatpush.msra.mxu0 %v443_v36  ;;  %492 = vmatpush.msra.mxu1 %v444_v37  ;;  %v709_v11 = vld [vmem:[%s1428_s24 + $0xc0] sm:$0xff]  ;;  %v708_v13 = vld [vmem:[%s1428_s24 + $0xb8] sm:$0xff]  ;;  %v707_v17 = vld [vmem:[%s1428_s24 + $0xb0] sm:$0xff] }
 0x189   : > { %720 = vmatpush.msra.mxu2 %v697_v60  ;;  %743 = vmatpush.msra.mxu3 %v713_v61  ;;  %v690_v22 = vld [vmem:[%s1428_s24 + $0x28] sm:$0xff]  ;;  %v689_v29 = vld [vmem:[%s1428_s24 + $0x20] sm:$0xff]  ;;  %v688_v37 = vld [vmem:[%s1428_s24 + $0x18] sm:$0xff] }
 0x18a   : > { %470 = vmatpush.msra.mxu0 %v441_v38  ;;  %493 = vmatpush.msra.mxu1 %v442_v39  ;;  %v706_v23 = vld [vmem:[%s1428_s24 + $0xa8] sm:$0xff]  ;;  %v705_v30 = vld [vmem:[%s1428_s24 + $0xa0] sm:$0xff]  ;;  %v704_v38 = vld [vmem:[%s1428_s24 + $0x98] sm:$0xff] }
 0x18b   : > { %721 = vmatpush.msra.mxu2 %v696_v62  ;;  %744 = vmatpush.msra.mxu3 %v712_v63  ;;  %v685_v59 = vld [vmem:[%s1428_s24] sm:$0xff] }
 0x18c   : > { %471 = vmatpush.msra.mxu0 %v439_v40  ;;  %494 = vmatpush.msra.mxu1 %v440_v41  ;;  %v701_v60 = vld [vmem:[%s1428_s24 + $0x80] sm:$0xff] }
 0x18d   : > { %722 = vmatpush.msra.mxu2 %v695_v0  ;;  %745 = vmatpush.msra.mxu3 %v711_v1 }
 0x18e   : > { %472 = vmatpush.msra.mxu0 %v437_v42  ;;  %495 = vmatpush.msra.mxu1 %v438_v43 }
 0x18f   : > { %723 = vmatpush.msra.mxu2 %v694_v6  ;;  %746 = vmatpush.msra.mxu3 %v710_v7 }
 0x190   : > { %473 = vmatpush.msra.mxu0 %v435_v44  ;;  %496 = vmatpush.msra.mxu1 %v436_v45  ;;  %v687_v45 = vld [vmem:[%s1428_s24 + $0x10] sm:$0xff] }
 0x191   : > { %724 = vmatpush.msra.mxu2 %v693_v10  ;;  %747 = vmatpush.msra.mxu3 %v709_v11 }
 0x192   : > { %474 = vmatpush.msra.mxu0 %v433_v46  ;;  %497 = vmatpush.msra.mxu1 %v434_v47  ;;  %v703_v46 = vld [vmem:[%s1428_s24 + $0x90] sm:$0xff] }
 0x193   : > { %725 = vmatpush.msra.mxu2 %v692_v12  ;;  %748 = vmatpush.msra.mxu3 %v708_v13 }
 0x194   : > { %475 = vmatpush.msra.mxu0 %v431_v48  ;;  %498 = vmatpush.msra.mxu1 %v432_v49 }
 0x195   : > { %726 = vmatpush.msra.mxu2 %v691_v16  ;;  %749 = vmatpush.msra.mxu3 %v707_v17 }
 0x196   : > { %476 = vmatpush.msra.mxu0 %v429_v50  ;;  %499 = vmatpush.msra.mxu1 %v430_v51  ;;  %v686_v51 = vld [vmem:[%s1428_s24 + $0x8] sm:$0xff] }
 0x197   : > { %477 = vmatmul.f32.vlgmr.msra.gmra.mxu0 %v427_v52  ;;  %500 = vmatmul.f32.vlgmr.msra.gmra.mxu1 %v427_v52  ;;  %v702_v52 = vld [vmem:[%s1428_s24 + $0x88] sm:$0xff] }
 0x198   : > { %727 = vmatpush.msra.mxu2 %v690_v22  ;;  %750 = vmatpush.msra.mxu3 %v706_v23 }
 0x19a   : > { %728 = vmatpush.msra.mxu2 %v689_v29  ;;  %751 = vmatpush.msra.mxu3 %v705_v30 }
 0x19c   : > { %729 = vmatpush.msra.mxu2 %v688_v37  ;;  %752 = vmatpush.msra.mxu3 %v704_v38 }
 0x19e   : > { %730 = vmatpush.msra.mxu2 %v687_v45  ;;  %753 = vmatpush.msra.mxu3 %v703_v46 }
 0x19f   : > { %480 = vmatmul.f32.gmra.mxu0 %v428_v53  ;;  %503 = vmatmul.f32.gmra.mxu1 %v428_v53 }
 0x1a0   : > { %731 = vmatpush.msra.mxu2 %v686_v51  ;;  %754 = vmatpush.msra.mxu3 %v702_v52 }
 0x1a2   : > { %732 = vmatpush.msra.mxu2 %v685_v59  ;;  %755 = vmatpush.msra.mxu3 %v701_v60 }
 0x214   : > { %v1508_v2 = vpop.f32.mrf.mxu0  ;;  %v1510_v3 = vpop.f32.mrf.mxu1 }
 0x215   : > { %v1513_v4 = vmul.f32 0.70710677, %v1508_v2  ;;  %v1516_v5 = vmul.f32 0.70710677, %v1510_v3 }
 0x217   : > { %v515_v8 = vmul.f32 %v1513_v4, %v1513_v4  ;;  %v555_v9 = vmul.f32 %v1516_v5, %v1516_v5 }
 0x219   : > { %v1528_v14 = vmin.f32 %v515_v8, 16.0  ;;  %v1530_v15 = vmin.f32 %v555_v9, 16.0 }
 0x21b   : > { %v517_v18 = vmul.f32 2.1237322e-06, %v1528_v14  ;;  %v557_v19 = vmul.f32 2.1237322e-06, %v1530_v15  ;;  %v528_v24 = vmul.f32 3.8918573e-05, %v1528_v14 }
 0x21c   : > { %v1536_v20 = vpop.f32.mrf.mxu0  ;;  %v1538_v21 = vpop.f32.mrf.mxu1  ;;  %v568_v34 = vmul.f32 3.8918573e-05, %v1530_v15 }
 0x21d   : > { %v518_v25 = vadd.f32 0.00028619796, %v517_v18  ;;  %v558_v26 = vadd.f32 0.00028619796, %v557_v19  ;;  %v1544_v27 = vmul.f32 0.70710677, %v1536_v20 }
 0x21e   : > { %v1547_v28 = vmul.f32 0.70710677, %v1538_v21  ;;  %v529_v33 = vadd.f32 0.001143296, %v528_v24  ;;  %v569_v42 = vadd.f32 0.001143296, %v568_v34 }
 0x21f   : > { %v519_v31 = vmul.f32 %v518_v25, %v1528_v14  ;;  %v559_v32 = vmul.f32 %v558_v26, %v1530_v15  ;;  %v595_v35 = vmul.f32 %v1544_v27, %v1544_v27 }
 0x220   : > { %v635_v36 = vmul.f32 %v1547_v28, %v1547_v28  ;;  %v530_v41 = vmul.f32 %v529_v33, %v1528_v14  ;;  %v570_v49 = vmul.f32 %v569_v42, %v1530_v15 }
 0x221   : > { %v520_v39 = vadd.f32 0.0036580483, %v519_v31  ;;  %v560_v40 = vadd.f32 0.0036580483, %v559_v32  ;;  %v1561_v43 = vmin.f32 %v595_v35, 16.0 }
 0x222   : > { %v1563_v44 = vmin.f32 %v635_v36, 16.0  ;;  %v531_v48 = vadd.f32 0.014752088, %v530_v41  ;;  %v571_v57 = vadd.f32 0.014752088, %v570_v49 }
 0x223   : > { %v521_v47 = vmul.f32 %v520_v39, %v1528_v14  ;;  %v597_v50 = vmul.f32 2.1237322e-06, %v1561_v43  ;;  %v608_v53 = vmul.f32 3.8918573e-05, %v1561_v43  ;;  %v561_v54 = vmul.f32 %v560_v40, %v1530_v15 }
 0x224   : > { %v637_v55 = vmul.f32 2.1237322e-06, %v1563_v44  ;;  %v532_v56 = vmul.f32 %v531_v48, %v1528_v14  ;;  %v572_v0 = vmul.f32 %v571_v57, %v1530_v15  ;;  %v648_v7 = vmul.f32 3.8918573e-05, %v1563_v44 }
 0x225   : > { %v598_v58 = vadd.f32 0.00028619796, %v597_v50  ;;  %v609_v61 = vadd.f32 0.001143296, %v608_v53  ;;  %v522_v62 = vadd.f32 0.05243302, %v521_v47 }
 0x226   : > { %v533_v63 = vadd.f32 0.112945676, %v532_v56  ;;  %v562_v8 = vadd.f32 0.05243302, %v561_v54  ;;  %v638_v9 = vadd.f32 0.00028619796, %v637_v55 }
 0x227   : > { %v599_v1 = vmul.f32 %v598_v58, %v1561_v43  ;;  %v610_v6 = vmul.f32 %v609_v61, %v1561_v43  ;;  %v573_v11 = vadd.f32 0.112945676, %v572_v0  ;;  %v523_v16 = vmul.f32 %v522_v62, %v1528_v14 }
 0x228   : > { %v534_v10 = vmul.f32 %v533_v63, %v1528_v14  ;;  %v649_v22 = vadd.f32 0.001143296, %v648_v7  ;;  %v563_v23 = vmul.f32 %v562_v8, %v1530_v15  ;;  %v639_v24 = vmul.f32 %v638_v9, %v1563_v44 }
 0x229   : > { %v600_v12 = vadd.f32 0.0036580483, %v599_v1  ;;  %v611_v13 = vadd.f32 0.014752088, %v610_v6  ;;  %v574_v18 = vmul.f32 %v573_v11, %v1530_v15  ;;  %v524_v32 = vadd.f32 0.18741608, %v523_v16 }
 0x22a   : > { %v535_v17 = vadd.f32 0.4994258, %v534_v10  ;;  %v650_v31 = vmul.f32 %v649_v22, %v1563_v44  ;;  %v564_v37 = vadd.f32 0.18741608, %v563_v23  ;;  %v640_v38 = vadd.f32 0.0036580483, %v639_v24 }
 0x22b   : > { %v612_v19 = vmul.f32 %v611_v13, %v1561_v43  ;;  %v575_v26 = vadd.f32 0.4994258, %v574_v18  ;;  %v601_v29 = vmul.f32 %v600_v12, %v1561_v43  ;;  %v525_v42 = vmul.f32 %v524_v32, %v1528_v14 }
 0x22c   : > { %v536_v25 = vmul.f32 %v535_v17, %v1528_v14  ;;  %v651_v36 = vadd.f32 0.014752088, %v650_v31  ;;  %v565_v46 = vmul.f32 %v564_v37, %v1530_v15  ;;  %v641_v47 = vmul.f32 %v640_v38, %v1563_v44 }
 0x22d   : > { %v613_v30 = vadd.f32 0.112945676, %v612_v19  ;;  %v576_v34 = vmul.f32 %v575_v26, %v1530_v15  ;;  %v602_v39 = vadd.f32 0.05243302, %v601_v29  ;;  %v526_v52 = vadd.f32 1.1283791, %v525_v42 }
 0x22e   : > { %v537_v33 = vadd.f32 1.0, %v536_v25  ;;  %v652_v41 = vmul.f32 %v651_v36, %v1563_v44  ;;  %v566_v56 = vadd.f32 1.1283791, %v565_v46  ;;  %v642_v14 = vadd.f32 0.05243302, %v641_v47 }
 0x22f   : > { %v614_v35 = vmul.f32 %v613_v30, %v1561_v43  ;;  %v577_v40 = vadd.f32 1.0, %v576_v34  ;;  %v603_v50 = vmul.f32 %v602_v39, %v1561_v43  ;;  %v527_v60 = vmul.f32 %v526_v52, %v1513_v4 }
 0x230   : > { %1103 = vrcp.f32 %v537_v33  ;;  %v653_v49 = vadd.f32 0.112945676, %v652_v41  ;;  %v549_v61 = vand.u32 2147483648, %v537_v33  ;;  %v547_v0 = vand.u32 2147483647, %v537_v33 }
 0x231   : > { %v615_v45 = vadd.f32 0.4994258, %v614_v35  ;;  %1105 = vrcp.f32 %v577_v40  ;;  %v604_v15 = vadd.f32 0.18741608, %v603_v50  ;;  %v567_v6 = vmul.f32 %v566_v56, %v1516_v5 }
 0x232   : > { %v654_v54 = vmul.f32 %v653_v49, %v1563_v44  ;;  %v643_v7 = vmul.f32 %v642_v14, %v1563_v44  ;;  %vm543_vm6 = vweird.f32 %v537_v33  ;;  %v589_v11 = vand.u32 2147483648, %v577_v40 }
 0x233   : > { %v616_v48 = vmul.f32 %v615_v45, %v1561_v43  ;;  %v605_v9 = vmul.f32 %v604_v15, %v1561_v43  ;;  %v550_v13 = vor.u32 1.1754944e-38, %v549_v61  ;;  %v587_v17 = vand.u32 2147483647, %v577_v40 }
 0x234   : > { %v655_v59 = vadd.f32 0.4994258, %v654_v54  ;;  %vm548_vm9 = vcmp.eq.f32.partialorder %v547_v0, 8.507059e+37  ;;  %v644_v19 = vadd.f32 0.18741608, %v643_v7  ;;  %vm583_vm10 = vweird.f32 %v577_v40 }
 0x235   : > { %v1599_v53 = vadd.f32 1.0, %v616_v48  ;;  %v606_v43 = vadd.f32 1.1283791, %v605_v9  ;;  %v590_v25 = vor.u32 1.1754944e-38, %v589_v11  ;;  %vm588_vm12 = vcmp.eq.f32.partialorder %v587_v17, 8.507059e+37 }
 0x236   : > { %v1104_v51 = vpop.eup %1103  ;;  %v656_v1 = vmul.f32 %v655_v59, %v1563_v44  ;;  %v507_v35 = vmul.f32 0.5, %v1508_v2  ;;  %v645_v38 = vmul.f32 %v644_v19, %v1563_v44  ;;  %v508_v2 = vmul.f32 0.5, %v1510_v3 }
 0x237   : > { %v539_v55 = vmul.f32 %v1104_v51, %v537_v33  ;;  %1107 = vrcp.f32 %v1599_v53  ;;  %v1106_v57 = vpop.eup %1105  ;;  %vm544_vm5 = vweird.f32 %v1104_v51  ;;  %v627_v30 = vand.u32 2147483647, %v1599_v53 }
 0x238   : > { %v579_v62 = vmul.f32 %v1106_v57, %v577_v40  ;;  %v1608_v12 = vadd.f32 1.0, %v656_v1  ;;  %vm545_vm7 = vmor %vm543_vm6, %vm544_vm5  ;;  %vm584_vm8 = vweird.f32 %v1106_v57  ;;  %v629_v31 = vand.u32 2147483648, %v1599_v53 }
 0x239   : > { %v540_v58 = vsub.f32 1.0, %v539_v55  ;;  %vm585_vm11 = vmor %vm583_vm10, %vm584_vm8  ;;  %vm623_vm14 = vweird.f32 %v1599_v53  ;;  %v607_v46 = vmul.f32 %v606_v43, %v1544_v27  ;;  %vm628_vm0 = vcmp.eq.f32.partialorder %v627_v30, 8.507059e+37 }
 0x23a   : > { %v580_v8 = vsub.f32 1.0, %v579_v62  ;;  %1109 = vrcp.f32 %v1608_v12  ;;  %v630_v42 = vor.u32 1.1754944e-38, %v629_v31  ;;  %v646_v44 = vadd.f32 1.1283791, %v645_v38 }
 0x23b   : > { %v541_v63 = vmul.f32 %v1104_v51, %v540_v58  ;;  %v667_v56 = vand.u32 2147483647, %v1608_v12  ;;  %vm663_vm2 = vweird.f32 %v1608_v12  ;;  %v509_v3 = vmul.f32 0.5, %v1536_v20 }
 0x23c   : > { %v581_v16 = vmul.f32 %v1106_v57, %v580_v8  ;;  %v647_v58 = vmul.f32 %v646_v44, %v1547_v28  ;;  %v510_v0 = vmul.f32 0.5, %v1538_v21  ;;  %v683_v8 = vld [vmem:[#allocation3 + $0x8] sm:$0xff]  ;;  %v684_v28 = vld [vmem:[#allocation3] sm:$0xff] }
 0x23d   : > { %v542_v10 = vadd.f32 %v1104_v51, %v541_v63  ;;  %v1108_v4 = vpop.eup %1107  ;;  %vm668_vm4 = vcmp.eq.f32.partialorder %v667_v56, 8.507059e+37 }
 0x23e   : > { %v619_v5 = vmul.f32 %v1108_v4, %v1599_v53  ;;  %v582_v23 = vadd.f32 %v1106_v57, %v581_v16  ;;  %vm624_vm13 = vweird.f32 %v1108_v4  ;;  %v669_v53 = vand.u32 2147483648, %v1608_v12 }
 0x23f   : > { %v546_v18 = vsel %vm545_vm7, %v1104_v51, %v542_v10  ;;  %vm625_vm15 = vmor %vm623_vm14, %vm624_vm13 }
 0x240   : > { %v551_v22 = vsel %vm548_vm9, %v550_v13, %v546_v18  ;;  %v620_v26 = vsub.f32 1.0, %v619_v5  ;;  %v586_v29 = vsel %vm585_vm11, %v1106_v57, %v582_v23  ;;  %v1110_v37 = vpop.eup %1109  ;;  %v670_v15 = vor.u32 1.1754944e-38, %v669_v53 }
 0x241   : > { %v552_v24 = vmul.f32 %v551_v22, %v527_v60  ;;  %v591_v33 = vsel %vm588_vm12, %v590_v25, %v586_v29  ;;  %v659_v45 = vmul.f32 %v1110_v37, %v1608_v12  ;;  %vm664_vm1 = vweird.f32 %v1110_v37 }
 0x242   : > { %v621_v34 = vmul.f32 %v1108_v4, %v620_v26  ;;  %v592_v36 = vmul.f32 %v591_v33, %v567_v6  ;;  %vm665_vm3 = vmor %vm663_vm2, %vm664_vm1 }
 0x243   : > { %v987_v32 = vclamps-f32 %v552_v24, 1.0  ;;  %v660_v51 = vsub.f32 1.0, %v659_v45 }
 0x244   : > { %v622_v40 = vadd.f32 %v1108_v4, %v621_v34  ;;  %v988_v41 = vclamps-f32 %v592_v36, 1.0 }
 0x245   : > { %v675_v39 = vadd.f32 1.0, %v987_v32  ;;  %v661_v55 = vmul.f32 %v1110_v37, %v660_v51 }
 0x246   : > { %v626_v48 = vsel %vm625_vm15, %v1108_v4, %v622_v40  ;;  %v676_v49 = vadd.f32 1.0, %v988_v41 }
 0x247   : > { %v679_v47 = vmul.f32 %v675_v39, %v507_v35  ;;  %v631_v50 = vsel %vm628_vm0, %v630_v42, %v626_v48  ;;  %v662_v27 = vadd.f32 %v1110_v37, %v661_v55 }
 0x248   : > { %v632_v52 = vmul.f32 %v631_v50, %v607_v46  ;;  %v680_v54 = vmul.f32 %v676_v49, %v508_v2 }
 0x249   : > { %733 = vmatmul.f32.vlgmr.msra.gmra.mxu2 %v679_v47  ;;  %v666_v59 = vsel %vm665_vm3, %v1110_v37, %v662_v27 }
 0x24a   : > { %v989_v14 = vclamps-f32 %v632_v52, 1.0  ;;  %756 = vmatmul.f32.vlgmr.msra.gmra.mxu3 %v680_v54  ;;  %v671_v61 = vsel %vm668_vm4, %v670_v15, %v666_v59 }
 0x24b   : > { %v672_v62 = vmul.f32 %v671_v61, %v647_v58 }
 0x24c   : > { %v677_v57 = vadd.f32 1.0, %v989_v14 }
 0x24d   : > { %v990_v63 = vclamps-f32 %v672_v62, 1.0 }
 0x24e   : > { %v681_v60 = vmul.f32 %v677_v57, %v509_v3 }
 0x24f   : > { %v678_v1 = vadd.f32 1.0, %v990_v63 }
 0x251   : > { %736 = vmatmul.f32.gmra.mxu2 %v681_v60  ;;  %v682_v6 = vmul.f32 %v678_v1, %v510_v0 }
 0x253   : > { %759 = vmatmul.f32.gmra.mxu3 %v682_v6 }
 0x2cc   : > { %v734_v7 = vpop.f32.mrf.mxu2 }
 0x2cd   : > { %v757_v20 = vpop.f32.mrf.mxu3 }
 0x2ce   : > { %v758_v9 = vadd.f32 %v757_v20, %v734_v7 }
 0x2d0   : > { %v763_v10 = vadd.f32 %v758_v9, %v683_v8 }
 0x2d2   : > { %765 = vst [vmem:[#allocation3 + $0x8] sm:$0xff] %v763_v10 }
 0x2d4   : > { %v737_v11 = vpop.f32.mrf.mxu2 }
 0x2d6   : > { %v760_v12 = vpop.f32.mrf.mxu3 }
 0x2d7   : > { %v761_v4 = vadd.f32 %v760_v12, %v737_v11  ;;  %770 = sbr.rel (%p991_p5) target bundleno = 879 (0x36f), region = 60 }
 0x2d9   : > { %v764_v13 = vadd.f32 %v761_v4, %v684_v28 }
 0x2db   : > { %766 = vst [vmem:[#allocation3] sm:$0xff] %v764_v13 }
 0x2dc   : > { %v790_v21 = vld [vmem:[#allocation3 + $0x8] sm:$0xff]  ;;  %v771_v17 = vlaneseq  ;;  %v1111_v5 = vld [vmem:[%s1444_s13] ss:$0 sm:$0xff]  ;;  %vm792_vm6 = vcmask 130048   ;;  %v835_v33 = vld [vmem:[#allocation9 + $0x8] sm:$0xff] }
 0x2dd   : > { %v1112_v19 = vld [vmem:[%s322_s16] ss:$0 sm:$0xff]  ;;  %v836_v36 = vld [vmem:[#allocation9 + $0x10] sm:$0xff]  ;;  %v837_v37 = vld [vmem:[#allocation9 + $0x18] sm:$0xff] }
 0x2de   : > { %v772_v18 = vshrl.u32 %v771_v17, 7  ;;  %v834_v30 = vld [vmem:[#allocation9] sm:$0xff] }
 0x2e0   : > { %v774_v22 = vadd.s32 16, %v772_v18  ;;  %v775_v23 = vadd.s32 24, %v772_v18  ;;  %vm778_vm5 = vcmp.eq.s32.totalorder %v772_v18, %v1111_v5  ;;  %v773_v43 = vadd.s32 8, %v772_v18 }
 0x2e1   : > { %v786_v24 = vsel %vm778_vm5, %v1112_v19, 0.0 }
 0x2e2   : > { %v791_v16 = vld [vmem:[#allocation3] sm:$0xff]  ;;  %vm780_vm7 = vcmp.eq.s32.totalorder %v774_v22, %v1111_v5  ;;  %vm781_vm8 = vcmp.eq.s32.totalorder %v775_v23, %v1111_v5  ;;  %vm779_vm9 = vcmp.eq.s32.totalorder %v773_v43, %v1111_v5 }
 0x2e3   : > { %1005 = vmatpush.msra.mxu2 %v791_v16  ;;  %1006 = vmatpush.msra.mxu3 %v791_v16  ;;  %v788_v25 = vsel %vm780_vm7, %v1112_v19, 0.0  ;;  %v789_v26 = vsel %vm781_vm8, %v1112_v19, 0.0  ;;  %v787_v29 = vsel %vm779_vm9, %v1112_v19, 0.0 }
 0x2e4   : > { %819 = vmatpush.msra.mxu0 %v791_v16  ;;  %1004 = vmatpush.msra.mxu1 %v791_v16 }
 0x2e5   : > { %1008 = vmatpush.msra.mxu2 %v790_v21  ;;  %1009 = vmatpush.msra.mxu3 %v790_v21 }
 0x2e6   : > { %820 = vmatpush.msra.mxu0 %v790_v21  ;;  %1007 = vmatpush.msra.mxu1 %v790_v21 }
 0x2e7   : > { %992 = vmatmul.msk.f32.vlgmr.msra.gmra.mxu0 %vm792_vm6, %v786_v24  ;;  %994 = vmatmul.msk.f32.vlgmr.msra.gmra.mxu2 %vm792_vm6, %v788_v25 }
 0x2e8   : > { %995 = vmatmul.msk.f32.vlgmr.msra.gmra.mxu3 %vm792_vm6, %v789_v26  ;;  %993 = vmatmul.msk.f32.vlgmr.msra.gmra.mxu1 %vm792_vm6, %v787_v29 }
 0x364   : > { %v822_v31 = vpop.f32.mrf.mxu0 }
 0x365   : > { %v838_v32 = vadd.f32 %v834_v30, %v822_v31  ;;  %v825_v34 = vpop.f32.mrf.mxu1 }
 0x366   : > { %v839_v35 = vadd.f32 %v835_v33, %v825_v34 }
 0x367   : > { %842 = vst [vmem:[#allocation9] sm:$0xff] %v838_v32 }
 0x368   : > { %843 = vst [vmem:[#allocation9 + $0x8] sm:$0xff] %v839_v35 }
 0x36a   : > { %v828_v38 = vpop.f32.mrf.mxu2 }
 0x36b   : > { %v831_v39 = vpop.f32.mrf.mxu3  ;;  %v840_v40 = vadd.f32 %v836_v36, %v828_v38 }
 0x36c   : > { %v841_v41 = vadd.f32 %v837_v37, %v831_v39 }
 0x36d   : > { %844 = vst [vmem:[#allocation9 + $0x10] sm:$0xff] %v840_v40 }
 0x36e   : > { %845 = vst [vmem:[#allocation9 + $0x18] sm:$0xff] %v841_v41 }
 0x36f PF: > { %s1684_s21 = sadd.s32 4294967295, %s1275_s25   ;;  %s853_s29 = sshll.u32 %s1667_s5, 4  ;;  %s854_s29 = int_to_ptr.hbm [resolvable:$true] %s853_s29 }
 0x370   : > { %p1026_p6 = scmp.eq.s32.totalorder %s1684_s21, 7  ;;  %s1284_s12 = smov [#allocation9]  }
 0x371   : > { %s851_s3 = sshll.u32 %s1284_s12, 4  ;;  %s1285_s24 = smov 128   ;;  %s852_s3 = int_to_ptr.vmem [resolvable:$true] %s851_s3 }
 0x372   : > { %s1286_s20 = smov 8  }
 0x373   : > { %1015 = dma.vmem_to_hbm [thread:$0]  (%p1026_p6), %s852_s3, 512, %s854_s29, [#allocation6], %s1285_s24, %s1285_s24, %s1286_s20  }
 0x374   : > { %1242 = dma.done.wait (%p1026_p6), [#allocation6], 512  }
 0x375   : > { %1244 = vsyncadd (%p1026_p6), [#allocation6], 4294966784 }
 0x376 PF: > { %s22_s25 = sadd.s32 1, %s1275_s25   ;;  %s1685_s10 = sld [smem:[#allocation13_spill]] }
 0x377   : > { %p19_p7 = scmp.ge.s32.totalorder %s22_s25, 10   ;;  %s1686_s20 = sld [smem:[#allocation17_spill]] }
 0x378   : > { %s1687_s22 = sld [smem:[#allocation14_spill]]  ;;  %s1690_s18 = smov %s1251_s19 }
 0x379   : > { %s1688_s13 = sld [smem:[#allocation15_spill]]  ;;  %s1692_s21 = smov %s1267_s23 }
 0x37a   : > { %s1689_s24 = sld [smem:[#allocation16_spill]] }
 0x37b   :  { %21 = sbr.rel (!%p19_p7) target bundleno = 10 (0xa), region = 108 }
 0x37c   : > { %s1691_s19 = smov %s1685_s10 }
 0x37f   : > { %s1693_s23 = smov %s1688_s13 }
 0x380   :  { %870 = vsyncpa [#allocation5], 1 }
 0x381   :  { %872 = vsyncpa [#allocation5 + $0x1], 1 }
 0x382   :  { %873 = vsyncpa [#allocation8], 1 }
 0x383   :  { %875 = vsyncpa [#allocation8 + $0x1], 1 }
 0x384   :  { %876 = vsyncpa [#allocation6], 1 }
 0x385   :  { %878 = vsyncpa [#allocation6 + $0x1], 1 }

</bundles_post_ra>
